<compile_context>
chip_gen: v7x
topology: tpu7x:2x2x1
jax: 0.10.0
libtpu: 0.0.40
codegen_flags: <defaults>
</compile_context>

<pallas_src>
import jax
import jax.numpy as jnp
from jax.experimental import pallas as pl
from jax.experimental.pallas import tpu as pltpu


def _conv1x1_kernel(w_ref, x_ref, o_ref):
    # w_ref: (C_out, C_in)   x_ref: (C_in, ts)   o_ref: (C_out, ts)
    o_ref[...] = jnp.dot(
        w_ref[...], x_ref[...], preferred_element_type=jnp.float32
    ).astype(o_ref.dtype)


def _pick_spatial_tile(s, c_in, c_out, itemsize, *, max_tile=2048,
                       vmem_budget=14 * 1024 * 1024):
    """Largest lane-dense spatial tile that fits a conservative VMEM budget.

    Budget is sized for the smallest default scoped-VMEM across v5e/v6e/v7x so
    double-buffering of the activation/output blocks stays intact without
    needing vmem_limit_bytes overrides.
    """
    if s <= 128:
        # Full-extent last dim satisfies the (8,128) layout rule directly.
        return s
    # Leave room for the resident weight block.
    budget = max(vmem_budget - c_out * c_in * itemsize, 2 * 1024 * 1024)
    ts = max_tile
    # Double-buffered x block + out block: 2 * (C_in + C_out) * ts * itemsize.
    while ts > 128 and 2 * (c_in + c_out) * ts * itemsize > budget:
        ts //= 2
    # Don't exceed the spatial extent (floor to a multiple of 128 so the block
    # never exceeds the array dimension; the ragged tail is handled by cdiv).
    return max(128, min(ts, (s // 128) * 128))


def conv1x1_forward(x, weight, stride=1, *, max_spatial_tile=2048):
    """Pallas 1x1 conv forward (matches nn.Conv2d(k=1, padding=0, bias=False)).

    x:      (N, C_in, H, W) float32, NCHW (PyTorch layout)
    weight: (C_out, C_in, 1, 1)
    returns (N, C_out, Ho, Wo) with Ho = floor((H-1)/stride)+1, same as PyTorch.
    """
    n, c_in, h, w = x.shape
    c_out = weight.shape[0]

    if stride != 1:
        # TODO(synk): fold the stride subsampling into the BlockSpec/DMA
        # instead of this wrapper slice (saves one strided pass over x).
        x = x[:, :, ::stride, ::stride]
    ho, wo = x.shape[2], x.shape[3]
    s = ho * wo

    # Free reshapes (no data movement): spatial becomes the lane dimension.
    x_rows = x.reshape(n, c_in, s)            # (N, C_in, S)
    w_mat = weight.reshape(c_out, c_in)       # (C_out, C_in)

    itemsize = jnp.dtype(x.dtype).itemsize
    ts = _pick_spatial_tile(s, c_in, c_out, itemsize, max_tile=max_spatial_tile)

    grid = (n, pl.cdiv(s, ts))

    out = pl.pallas_call(
        _conv1x1_kernel,
        out_shape=jax.ShapeDtypeStruct((n, c_out, s), x.dtype),
        grid_spec=pltpu.PrefetchScalarGridSpec(
            num_scalar_prefetch=0,
            grid=grid,
            in_specs=[
                # Loop-invariant weight: whole-array block, constant index_map
                # -> fetched once, stays resident in VMEM.
                pl.BlockSpec((c_out, c_in), lambda b, j: (0, 0)),
                # Activations: batch squeezed, channels on sublanes, spatial on
                # lanes (tile is a multiple of 128 or the full extent).
                pl.BlockSpec((None, c_in, ts), lambda b, j: (b, 0, j)),
            ],
            out_specs=pl.BlockSpec((None, c_out, ts), lambda b, j: (b, 0, j)),
        ),
        compiler_params=pltpu.CompilerParams(
            dimension_semantics=("parallel", "parallel"),
        ),
    )(w_mat, x_rows)

    return out.reshape(n, c_out, ho, wo)


def reference_conv1x1(x, weight, stride=1):
    """Pure-JAX reference matching nn.Conv2d(k=1, padding=0, bias=False)."""
    if stride != 1:
        x = x[:, :, ::stride, ::stride]
    w_mat = weight.reshape(weight.shape[0], weight.shape[1])  # (C_out, C_in)
    return jnp.einsum("nchw,oc->nohw", x, w_mat)


if __name__ == "__main__":
    key = jax.random.PRNGKey(0)
    kx, kw, kx2 = jax.random.split(key, 3)

    # Small shapes consistent with the module: N=2, C_in=4, C_out=8, H=W=16.
    N, C_IN, C_OUT, H, W = 2, 4, 8, 16, 16

    x = jax.random.normal(kx, (N, C_IN, H, W), dtype=jnp.float32)
    weight = jax.random.normal(kw, (C_OUT, C_IN, 1, 1), dtype=jnp.float32) * 0.1

    # --- stride = 1 ---
    y = jax.block_until_ready(conv1x1_forward(x, weight, stride=1))
    y_ref = reference_conv1x1(x, weight, stride=1)
    assert y.shape == y_ref.shape, (y.shape, y_ref.shape)
    assert jnp.allclose(y, y_ref, atol=1e-5, rtol=1e-5)

    # --- stride = 2 (spatial subsample path, S <= 128 full-extent block) ---
    y2 = jax.block_until_ready(conv1x1_forward(x, weight, stride=2))
    y2_ref = reference_conv1x1(x, weight, stride=2)
    assert y2.shape == y2_ref.shape, (y2.shape, y2_ref.shape)
    assert jnp.allclose(y2, y2_ref, atol=1e-5, rtol=1e-5)

    # --- ragged spatial extent (S = 576, tile = 512, cdiv grid, no pad) ---
    x_r = jax.random.normal(kx2, (N, C_IN, 24, 24), dtype=jnp.float32)
    y3 = jax.block_until_ready(conv1x1_forward(x_r, weight, stride=1))
    y3_ref = reference_conv1x1(x_r, weight, stride=1)
    assert y3.shape == y3_ref.shape, (y3.shape, y3_ref.shape)
    assert jnp.allclose(y3, y3_ref, atol=1e-5, rtol=1e-5)

    print("KERNEL_OK")
</pallas_src>

<mosaic_0001>
module attributes {stable_mosaic.version = 11 : i64} {
  func.func @_conv1x1_kernel(%arg0: i32, %arg1: i32, %arg2: memref<8x4xf32, #tpu.memory_space<vmem>>, %arg3: memref<1x4x256xf32, #tpu.memory_space<vmem>>, %arg4: memref<1x8x256xf32, #tpu.memory_space<vmem>>) attributes {dimension_semantics = [#tpu.dimension_semantics<parallel>, #tpu.dimension_semantics<parallel>], iteration_bounds = array<i64: 2, 1>, scalar_prefetch = 0 : i64, scratch_operands = 0 : i64, tpu.core_type = #tpu.core_type<tc>, window_params = [{pipeline_mode = #tpu.pipeline_mode<synchronous>, transform_indices = @transform_0, window_bounds = array<i64: 8, 4>}, {transform_indices = @transform_1, window_bounds = array<i64: 1, 4, 256>}, {transform_indices = @transform_2, window_bounds = array<i64: 1, 8, 256>}]} {
    %c0 = arith.constant 0 : index
    %c0_0 = arith.constant 0 : index
    %0 = vector.load %arg2[%c0, %c0_0] : memref<8x4xf32, #tpu.memory_space<vmem>>, vector<8x4xf32>
    %c0_1 = arith.constant 0 : index
    %c0_2 = arith.constant 0 : index
    %c0_3 = arith.constant 0 : index
    %1 = vector.load %arg3[%c0_1, %c0_2, %c0_3] : memref<1x4x256xf32, #tpu.memory_space<vmem>>, vector<1x4x256xf32>
    %2 = vector.shape_cast %1 : vector<1x4x256xf32> to vector<4x256xf32>
    %cst = arith.constant dense<0.000000e+00> : vector<8x256xf32>
    %3 = tpu.matmul %0, %2, %cst {dimension_numbers = #tpu.dot_dimension_numbers<[1], [0], [0], [1], [0, 0, 1, 1], [], []>} : vector<8x4xf32>, vector<4x256xf32>, vector<8x256xf32> -> vector<8x256xf32>
    %c0_4 = arith.constant 0 : index
    %c0_5 = arith.constant 0 : index
    %c0_6 = arith.constant 0 : index
    %4 = vector.load %arg4[%c0_4, %c0_5, %c0_6] : memref<1x8x256xf32, #tpu.memory_space<vmem>>, vector<1x8x256xf32>
    %5 = vector.shape_cast %4 : vector<1x8x256xf32> to vector<8x256xf32>
    %6 = vector.shape_cast %3 : vector<8x256xf32> to vector<1x8x256xf32>
    tpu.vector_store %arg4[%c0_4, %c0_5, %c0_6], %6 {strides = array<i32>} : memref<1x8x256xf32, #tpu.memory_space<vmem>>, vector<1x8x256xf32>,
    return
  }
  func.func @transform_0(%arg0: i32, %arg1: i32) -> (i32, i32) {
    %c0_i32 = arith.constant 0 : i32
    %c0_i32_0 = arith.constant 0 : i32
    %c0_i32_1 = arith.constant 0 : i32
    return %c0_i32, %c0_i32_0 : i32, i32
  }
  func.func @transform_1(%arg0: i32, %arg1: i32) -> (i32, i32, i32) {
    %c0_i32 = arith.constant 0 : i32
    %c0_i32_0 = arith.constant 0 : i32
    return %arg0, %c0_i32, %arg1 : i32, i32, i32
  }
  func.func @transform_2(%arg0: i32, %arg1: i32) -> (i32, i32, i32) {
    %c0_i32 = arith.constant 0 : i32
    %c0_i32_0 = arith.constant 0 : i32
    return %arg0, %c0_i32, %arg1 : i32, i32, i32
  }
}

</mosaic_0001>

<bundles_post_ra>
// kernel: tpu_custom_call.1
= control target key start
LH: loop header
LB: loop body
LE: loop exit
PB: predicated region body
PF: predicated region fallthrough
CT: control target
= control target key end

     0   :  { %7 = vsyncpa [#allocation3], 0  ;;  %s759_s0 = inlined_call_operand.vmem [shape: f32[8,4], index: 0, kind: input, shape index: {}]   ;;  %s760_s1 = inlined_call_operand.hbm [shape: f32[2,4,256], index: 1, kind: input, shape index: {}]   ;;  %s761_s2 = inlined_call_operand.hbm [shape: f32[2,8,256], index: 2, kind: output, shape index: {}]  }
   0x1   :  { %9 = vsyncpa [#allocation3 + $0x1], 0 }
   0x2   :  { %10 = vsyncpa [#allocation4], 0 }
   0x3   :  { %12 = vsyncpa [#allocation4 + $0x1], 0  ;;  %s583_s9 = smov 0   ;;  %s585_s10 = smov 0  }
   0x4   :  { %s587_s11 = smov 0   ;;  %s589_s12 = smov 0  }
   0x5   :  { %s591_s13 = smov 0   ;;  %s593_s14 = smov 0  }
   0x6 LB: > { %s367_s15 = sadd.s32 4294967295, %s563_s14   ;;  %s368_s16 = sadd.s32 4294967294, %s563_s14   ;;  %s563_s14 = sphi %s593_s14, %s18_s14   ;;  %s559_s13 = sphi %s591_s13, %s777_s13   ;;  %s555_s12 = sphi %s589_s12, %s776_s12   ;;  %s551_s11 = sphi %s587_s11, %s775_s11   ;;  %s547_s10 = sphi %s585_s10, %s774_s10   ;;  %s543_s9 = sphi %s583_s9, %s773_s9  }
   0x7   : > { %s30_s17 = sadd.s32 1, %s559_s13  ;;  %s60_s18 = sadd.s32 1, %s551_s11 }
   0x8   : > { %p32_p0 = scmp.ge.s32.totalorder %s30_s17, 2  ;;  %p67_p1 = scmp.ne.s32.totalorder %s551_s11, %s547_s10 }
   0x9   : > { %p68_p2 = scmp.eq.s32.totalorder %s563_s14, 0  ;;  %p73_p3 = scmp.ne.s32.totalorder %s547_s10, %s543_s9 }
   0xa   : > { %s779_s17 = smov (%p32_p0, %s30_s17), 0  ;;  %p74_p5 = scmp.eq.s32.totalorder %s367_s15, 0 }
   0xb   : > { %p624_p4 = por %p68_p2, %p67_p1  ;;  %s55_s20 = ssub.s32 %s559_s13, %s779_s17 }
   0xc   : > { %p99_p6 = scmp.eq.s32.totalorder %s367_s15, 1  ;;  %p58_p7 = scmp.eq.s32.totalorder %s55_s20, 0 }
   0xd   : > { %p630_p8 = por %p74_p5, %p73_p3  ;;  %p105_p10 = scmp.eq.s32.totalorder %s368_s16, 1 }
   0xe   : > { %p634_p9 = por %p99_p6, %p67_p1  ;;  %p399_p13 = scmp.lt.s32.totalorder %s563_s14, 2 }
   0xf   : > { %s639_s23 = scalar_select %p58_p7, %s551_s11, %s60_s18  }
  0x10   : > { %s765_s22 = scalar_select %p634_p9, 1, 0 }
  0x11   : > { %p641_p11 = por %p105_p10, %p73_p3  ;;  %s128_s25 = sand.u32 1, %s551_s11  }
  0x12   : > { %s371_s26 = sshll.u32 %s128_s25, 3  ;;  %s385_s27 = sshll.u32 %s559_s13, 7 }
  0x13   : > { %s766_s24 = scalar_select %p641_p11, 1, 0 }
  0x14   : > { %s652_s30 = scalar_lea.hbm %s760_s1, %s385_s27  ;;  %s132_s3 = scalar_lea.vmem [#allocation2], %s371_s26 }
  0x15   : > { %s142_s4 = sshll.u32 %s132_s3, 4  ;;  %p658_p0 = pnand %p399_p13, %p624_p4  ;;  %s654_s4 = int_to_ptr.vmem [resolvable:$true] %s142_s4 }
  0x16   : > { %s129_s6 = scalar_lea.sflag [#allocation3], %s128_s25  ;;  %s451_s7 = scalar_lea.hbm %s652_s30, 128 }
  0x17   : > { %p452_p3 = scmp.ne.s32.totalorder %s652_s30, %s451_s7  ;;  %p453_p5 = pneg %p658_p0 }
  0x18   : > { %s456_s16 = scalar_lea.hbm %s760_s1, 256  ;;  %p457_p4 = scmp.lt.u32.totalorder %s652_s30, %s760_s1 }
  0x19   : > { %p454_p6 = pnand %p453_p5, %p452_p3  ;;  %p458_p10 = scmp.lt.u32.totalorder %s456_s16, %s451_s7 }
  0x1a   : > { %p460_p12 = scmp.lt.u32.totalorder %s451_s7, %s652_s30 }
  0x1b   : > { %p455_p7 = pneg %p454_p6  ;;  %p459_p13 = por %p458_p10, %p457_p4 }
  0x1d   : > { %p461_p1 = por %p460_p12, %p459_p13 }
  0x1f   : > { %p462_p2 = pnand %p461_p1, %p455_p7 }
  0x21   : > { %465 = shalt.err (!%p462_p2)
}
  0x22   : > { %s466_s20 = scalar_lea.vmem %s654_s4, 128  ;;  %s565_s25 = smov [#allocation2]  }
  0x23   : > { %p467_p3 = scmp.ne.s32.totalorder %s654_s4, %s466_s20  ;;  %s471_s26 = sshll.u32 %s565_s25, 4  ;;  %s472_s26 = int_to_ptr.vmem [resolvable:$false] %s471_s26 }
  0x24   : > { %s473_s27 = scalar_lea.vmem %s472_s26, 256  ;;  %p474_p9 = scmp.lt.s32.totalorder %s654_s4, %s472_s26 }
  0x25   : > { %p469_p6 = pnand %p467_p3, %p453_p5  ;;  %p475_p4 = scmp.lt.s32.totalorder %s473_s27, %s466_s20 }
  0x27   : > { %p470_p11 = pneg %p469_p6  ;;  %p476_p10 = por %p475_p4, %p474_p9 }
  0x29   : > { %p477_p12 = pnand %p476_p10, %p470_p11 }
  0x2b   : > { %480 = shalt.err (!%p477_p12)
}
  0x2c   : > { %394 = dma.hbm_to_vmem [thread:$0]  (!%p658_p0), %s652_s30, 128, %s654_s4, %s129_s6  }
  0x2d   : > { %p768_p1 = scmp.lt.s32.totalorder %s563_s14, 3  ;;  %p769_p2 = scmp.ge.s32.totalorder %s563_s14, 1 }
  0x2f   : > { %p148_p5 = pnand %p769_p2, %p768_p1 }
  0x30   : > { %s694_s28 = sand.u32 (!%p148_p5), 1, %s547_s10  }
  0x31   : > { %151 = sbr.rel (%p148_p5) target bundleno = 289 (0x121), region = 28  ;;  %s375_s29 = sshll.u32 (!%p148_p5), %s694_s28, 3 }
  0x32   : > { %s154_s3 = scalar_lea.sflag (!%p148_p5), [#allocation3], %s694_s28  ;;  %s157_s7 = scalar_lea.vmem (!%p148_p5), [#allocation2], %s375_s29 }
  0x38   : > { %534 = dma.done.wait (%p630_p8), %s154_s3, 128  }
  0x39   : > { %536 = vsyncadd (%p630_p8), %s154_s3, 4294967168  ;;  %v566_v0 = vmov 0.0   ;;  %v181_v1 = vld [vmem:[%s157_s7] sm:$0xff]  ;;  %vm188_vm0 = vcmask 1043456   ;;  %vm184_vm1 = vcmask 31744   ;;  %s376_s5 = sshll.u32 %s694_s28, 4 }
  0x3a   : > { %257 = vmatprep.mubr.f32.mxu0 %v566_v0  ;;  %v183_v2 = vcombine.high %v181_v1, %v181_v1  ;;  %v180_v3 = vld [vmem:[%s759_s0] sm:$0xff]  ;;  %s177_s21 = scalar_lea.vmem [#allocation5], %s376_s5  ;;  %s386_s8 = sshll.u32 %s555_s12, 8 }
  0x3b   : > { %s283_s6 = sshll.u32 %s177_s21, 4  ;;  %s712_s18 = scalar_lea.hbm %s761_s2, %s386_s8  ;;  %s707_s6 = int_to_ptr.vmem [resolvable:$true] %s283_s6 }
  0x3c   : > { %377 = vmatprep.subr.msk.mxu0 %vm188_vm0, %v183_v2  ;;  %s267_s19 = scalar_lea.sflag [#allocation4], %s694_s28  ;;  %s481_s20 = scalar_lea.vmem %s707_s6, 256 }
  0x3d   : > { %378 = vmatpush1.msk.msra.mxu0 %vm188_vm0, %v181_v1  ;;  %p482_p8 = scmp.ne.s32.totalorder %s707_s6, %s481_s20  ;;  %p770_p9 = scmp.ne.s32.totalorder %s765_s22, 0 }
  0x3e   : > { %379 = vmatmul.mubr.msk.f32.vlgmr.msra.gmra.mrb[0].mxu0 %vm184_vm1, %v180_v3  ;;  %s567_s12 = smov [#allocation5]  }
  0x3f   : > { %p483_p11 = pnand %p482_p8, %p770_p9  ;;  %s485_s25 = sshll.u32 %s567_s12, 4  ;;  %s486_s25 = int_to_ptr.vmem [resolvable:$false] %s485_s25 }
  0x40   : > { %s487_s26 = scalar_lea.vmem %s486_s25, 512  ;;  %p488_p7 = scmp.lt.s32.totalorder %s707_s6, %s486_s25 }
  0x41   : > { %p484_p0 = pneg %p483_p11  ;;  %p489_p13 = scmp.lt.s32.totalorder %s487_s26, %s481_s20 }
  0x43   : > { %p490_p3 = por %p489_p13, %p488_p7 }
  0x45   : > { %p491_p6 = pnand %p490_p3, %p484_p0 }
 0x111   : > { %v259_v4 = vpop.f32.mrb[0].mxu0 }
 0x112   : > { %264 = vst [vmem:[%s177_s21] sm:$0xff] %v259_v4  ;;  %v261_v5 = vpop.f32.mrb[1].mxu0 }
 0x113   : > { %265 = vst [vmem:[%s177_s21 + $0x8] sm:$0xff] %v261_v5 }
 0x114   : > { %494 = shalt.err (!%p491_p6)
}
 0x115   : > { %s495_s27 = scalar_lea.hbm %s712_s18, 256  ;;  %s499_s3 = scalar_lea.hbm %s761_s2, 512 }
 0x116   : > { %p496_p4 = scmp.ne.s32.totalorder %s712_s18, %s495_s27  ;;  %p500_p1 = scmp.lt.u32.totalorder %s712_s18, %s761_s2 }
 0x117   : > { %p501_p2 = scmp.lt.u32.totalorder %s499_s3, %s495_s27  ;;  %p503_p8 = scmp.lt.u32.totalorder %s495_s27, %s712_s18 }
 0x118   : > { %p497_p10 = pnand %p496_p4, %p770_p9 }
 0x119   : > { %p502_p5 = por %p501_p2, %p500_p1 }
 0x11a   : > { %p498_p12 = pneg %p497_p10 }
 0x11b   : > { %p504_p11 = por %p503_p8, %p502_p5 }
 0x11d   : > { %p505_p0 = pnand %p504_p11, %p498_p12 }
 0x11f   : > { %508 = shalt.err (!%p505_p0)
}
 0x120   : > { %389 = dma.vmem_to_hbm [thread:$0]  (%p770_p9), %s707_s6, 256, %s712_s18, %s267_s19  }
 0x121 PF: > { %s295_s4 = sand.u32 1, %s543_s9   ;;  %p771_p7 = scmp.ne.s32.totalorder %s766_s24, 0 }
 0x122   : > { %p772_p13 = scmp.ge.s32.totalorder %s563_s14, 2  ;;  %s296_s5 = scalar_lea.sflag [#allocation4], %s295_s4 }
 0x124   : > { %p396_p3 = pnand %p772_p13, %p771_p7 }
 0x126   : > { %538 = dma.done.wait (!%p396_p3), %s296_s5, 256  }
 0x127   : > { %540 = vsyncadd (!%p396_p3), %s296_s5, 4294967040  ;;  %s18_s14 = sadd.s32 1, %s563_s14   ;;  %s773_s9 = smov %s547_s10 }
 0x128   : > { %p15_p6 = scmp.ge.s32.totalorder %s18_s14, 4   ;;  %s774_s10 = smov %s551_s11 }
 0x129   : > { %s775_s11 = smov %s639_s23  ;;  %s776_s12 = smov %s559_s13 }
 0x12a   : > { %s777_s13 = smov %s779_s17  ;;  %17 = sbr.rel (!%p15_p6) target bundleno = 6 (0x6), region = 73 }
 0x131   :  { %301 = vsyncpa [#allocation3], 1 }
 0x132   :  { %303 = vsyncpa [#allocation3 + $0x1], 1 }
 0x133   :  { %304 = vsyncpa [#allocation4], 1 }
 0x134   :  { %306 = vsyncpa [#allocation4 + $0x1], 1 }

</bundles_post_ra>
